<compile_context>
chip_gen: v7x
topology: tpu7x:2x2x1
jax: 0.10.0
libtpu: 0.0.40
codegen_flags: <defaults>
</compile_context>

<pallas_src>
import math
from functools import partial

import jax
import jax.numpy as jnp
from jax import lax
from jax.experimental import pallas as pl
from jax.experimental.pallas import tpu as pltpu

NEG_INF = -1e30
VMEM_LIMIT = 48 * 1024 * 1024


def _pick_tile(dim, preferred, align):
    """Largest tile <= preferred that divides `dim` and is a multiple of `align`;
    falls back to the full dim (always a legal block shape)."""
    if dim <= preferred:
        return dim
    t = (preferred // align) * align
    while t >= align:
        if dim % t == 0:
            return t
        t -= align
    return dim


# ----------------------------------------------------------------------------
# Tiled linear kernel: y = x @ w_t + b  (bf16 MXU inputs, f32 accumulation)
# ----------------------------------------------------------------------------
def _linear_kernel(x_ref, w_ref, b_ref, o_ref, acc_ref):
    @pl.when(pl.program_id(2) == 0)
    def _():
        acc_ref[...] = jnp.zeros_like(acc_ref)

    acc_ref[...] += jnp.dot(x_ref[...], w_ref[...],
                            preferred_element_type=jnp.float32)

    @pl.when(pl.program_id(2) == pl.num_programs(2) - 1)
    def _():
        o_ref[...] = (acc_ref[...] + b_ref[...].astype(jnp.float32)).astype(o_ref.dtype)


def linear(x, w_t, b, out_dtype=jnp.float32, tm=256, tn=512, tk=512):
    """y = x @ w_t + b.  x: (..., K), w_t: (K, N) (pre-transposed), b: (N,)."""
    lead = x.shape[:-1]
    K = x.shape[-1]
    N = w_t.shape[-1]
    x2 = x.reshape(-1, K).astype(jnp.bfloat16)
    w_t = w_t.astype(jnp.bfloat16)
    M = x2.shape[0]

    tm = _pick_tile(M, tm, 8)
    tn = _pick_tile(N, tn, 128)
    tk = _pick_tile(K, tk, 128)
    grid = (M // tm, N // tn, K // tk)

    flops = 2 * M * N * K
    bytes_accessed = (M * K * 2 + K * N * 2 + N * 4
                      + M * N * jnp.dtype(out_dtype).itemsize)

    out = pl.pallas_call(
        _linear_kernel,
        out_shape=jax.ShapeDtypeStruct((M, N), out_dtype),
        grid=grid,
        in_specs=[
            pl.BlockSpec((tm, tk), lambda i, j, k: (i, k)),
            pl.BlockSpec((tk, tn), lambda i, j, k: (k, j)),
            pl.BlockSpec((1, tn), lambda i, j, k: (0, j)),
        ],
        out_specs=pl.BlockSpec((tm, tn), lambda i, j, k: (i, j)),
        scratch_shapes=[pltpu.VMEM((tm, tn), jnp.float32)],
        compiler_params=pltpu.CompilerParams(
            dimension_semantics=("parallel", "parallel", "arbitrary"),
            vmem_limit_bytes=VMEM_LIMIT),
        cost_estimate=pl.CostEstimate(flops=flops, transcendentals=0,
                                      bytes_accessed=bytes_accessed),
    )(x2, w_t, b.reshape(1, N).astype(jnp.float32))
    return out.reshape(*lead, N)


# ----------------------------------------------------------------------------
# Multi-head attention kernel: all heads of one batch per grid step.
#   q: (B,Sq,E), k/v: (B,Sk,E) with heads contiguous along E ("(h d)" layout).
#   key_bias: (B,1,Sk) additive f32 (0 valid / -1e30 invalid).
#   Structural masks (causal / cross eye) are generated in-kernel from iota.
# ----------------------------------------------------------------------------
def _mha_kernel(q_ref, k_ref, v_ref, kbias_ref, o_ref, *,
                num_heads, scale, causal, gen_eye, kv_offset):
    tq = q_ref.shape[1]
    Sk = k_ref.shape[1]
    E = q_ref.shape[2]
    D = E // num_heads

    # additive mask built in registers (never materialized in HBM)
    kbias = kbias_ref[0].astype(jnp.float32)                       # (1, Sk)
    if causal or gen_eye:
        q_pos = (lax.broadcasted_iota(jnp.int32, (tq, Sk), 0)
                 + pl.program_id(1) * tq)
        k_pos = lax.broadcasted_iota(jnp.int32, (tq, Sk), 1)
        conds = []
        if causal:
            conds.append(k_pos <= q_pos)
        if gen_eye:
            conds.append((k_pos < kv_offset) | ((k_pos - kv_offset) == q_pos))
        allowed = conds[0]
        for c in conds[1:]:
            allowed = allowed & c
        bias = jnp.where(allowed, kbias, NEG_INF)                  # (tq, Sk)
    else:
        bias = kbias                                               # (1, Sk)

    # K/V/Q loaded once per grid step; softmax scale folded into q.
    q = (q_ref[0].astype(jnp.float32) * scale).astype(jnp.bfloat16)  # (tq, E)
    k = k_ref[0]                                                     # (Sk, E) bf16
    v = v_ref[0]                                                     # (Sk, E) bf16

    # TODO(synk): for very long key sequences (v7x 64 MiB VMEM), tile Sk with an
    # online-softmax accumulator instead of the full (tq, Sk) score matrix.
    outs = []
    for h in range(num_heads):
        lo = h * D
        hi = lo + D
        qh = q[:, lo:hi]                                           # (tq, D) bf16
        kh = k[:, lo:hi]                                           # (Sk, D) bf16
        vh = v[:, lo:hi]                                           # (Sk, D) bf16
        # contract last dims of both operands -> no k transpose/relayout
        s = lax.dot_general(qh, kh, (((1,), (1,)), ((), ())),
                            preferred_element_type=jnp.float32)    # (tq, Sk)
        s = s + bias
        m = jnp.max(s, axis=-1, keepdims=True)
        p = jnp.exp(s - m)
        denom = jnp.sum(p, axis=-1, keepdims=True)
        oh = jnp.dot(p.astype(jnp.bfloat16), vh,
                     preferred_element_type=jnp.float32)           # (tq, D)
        outs.append(oh * pl.reciprocal(denom, approx=True))
    # single lane-dense store of all heads: (tq, E)
    o_ref[0] = jnp.concatenate(outs, axis=-1).astype(o_ref.dtype)


def multihead_attention(q, k, v, key_bias, num_heads, scale,
                        causal=False, gen_eye=False, kv_offset=0, tq=512):
    B, Sq, E = q.shape
    Sk = k.shape[1]
    D = E // num_heads

    tq = _pick_tile(Sq, tq, 8)
    grid = (B, Sq // tq)

    q = q.astype(jnp.bfloat16)
    k = k.astype(jnp.bfloat16)
    v = v.astype(jnp.bfloat16)
    key_bias = key_bias.reshape(B, 1, Sk).astype(jnp.float32)

    flops = 4 * B * num_heads * Sq * Sk * D
    transcendentals = B * num_heads * Sq * Sk
    bytes_accessed = (B * Sq * E * 2 + 2 * B * Sk * E * 2 + B * Sk * 4
                      + B * Sq * E * 2)

    return pl.pallas_call(
        partial(_mha_kernel, num_heads=num_heads, scale=scale,
                causal=causal, gen_eye=gen_eye, kv_offset=kv_offset),
        out_shape=jax.ShapeDtypeStruct((B, Sq, E), jnp.bfloat16),
        grid=grid,
        in_specs=[
            pl.BlockSpec((1, tq, E), lambda b, i: (b, i, 0)),
            # K/V block index is independent of the q-tile axis -> DMA'd once per batch
            pl.BlockSpec((1, Sk, E), lambda b, i: (b, 0, 0)),
            pl.BlockSpec((1, Sk, E), lambda b, i: (b, 0, 0)),
            pl.BlockSpec((1, 1, Sk), lambda b, i: (b, 0, 0)),
        ],
        out_specs=pl.BlockSpec((1, tq, E), lambda b, i: (b, i, 0)),
        compiler_params=pltpu.CompilerParams(
            dimension_semantics=("parallel", "parallel"),
            vmem_limit_bytes=VMEM_LIMIT),
        cost_estimate=pl.CostEstimate(flops=flops,
                                      transcendentals=transcendentals,
                                      bytes_accessed=bytes_accessed),
    )(q, k, v, key_bias)


# ----------------------------------------------------------------------------
# Pure-JAX reference helpers (for correctness check only)
# ----------------------------------------------------------------------------
def _ref_linear(x, w_t, b, out_dtype=jnp.float32, **_):
    xb = x.astype(jnp.bfloat16).astype(jnp.float32)
    y = xb @ w_t.astype(jnp.float32) + b.astype(jnp.float32)
    return y.astype(out_dtype)


def _ref_attn(q, k, v, key_bias, num_heads, scale,
              causal=False, gen_eye=False, kv_offset=0, **_):
    B, Sq, E = q.shape
    Sk = k.shape[1]
    H, D = num_heads, E // num_heads
    qh = q.astype(jnp.float32).reshape(B, Sq, H, D).transpose(0, 2, 1, 3)
    kh = k.astype(jnp.float32).reshape(B, Sk, H, D).transpose(0, 2, 1, 3)
    vh = v.astype(jnp.float32).reshape(B, Sk, H, D).transpose(0, 2, 1, 3)
    s = jnp.einsum("bhqd,bhkd->bhqk", qh, kh) * scale
    bias = jnp.broadcast_to(key_bias[:, None, None, :].astype(jnp.float32), s.shape)
    q_pos = jnp.arange(Sq)[:, None]
    k_pos = jnp.arange(Sk)[None, :]
    allowed = jnp.ones((Sq, Sk), bool)
    if causal:
        allowed = allowed & (k_pos <= q_pos)
    if gen_eye:
        allowed = allowed & ((k_pos < kv_offset) | ((k_pos - kv_offset) == q_pos))
    bias = jnp.where(allowed[None, None], bias, NEG_INF)
    p = jax.nn.softmax(s + bias, axis=-1)
    o = jnp.einsum("bhqk,bhkd->bhqd", p, vh)
    return o.transpose(0, 2, 1, 3).reshape(B, Sq, E).astype(q.dtype)


# ----------------------------------------------------------------------------
# FlashscGPTMHA forward
# ----------------------------------------------------------------------------
def init_params(key, embed_dim):
    E = embed_dim
    keys = jax.random.split(key, 8)
    s = 0.05

    def w(k, shape):  # pre-transposed (in_features, out_features), bf16 for the MXU
        return (jax.random.normal(k, shape, jnp.float32) * s).astype(jnp.bfloat16)

    def b(k, shape):
        return jax.random.normal(k, shape, jnp.float32) * s

    return {
        "Wqkv_wT": w(keys[0], (E, 3 * E)),         # nn.Linear(E, 3E), transposed
        "Wqkv_b": b(keys[1], (3 * E,)),
        "out_proj_wT": w(keys[2], (E, E)),
        "out_proj_b": b(keys[3], (E,)),
        "cross_in_proj_wT": w(keys[4], (E, 3 * E)),  # MultiheadAttention in_proj, transposed
        "cross_in_proj_b": b(keys[5], (3 * E,)),
        "cross_out_proj_wT": w(keys[6], (E, E)),
        "cross_out_proj_b": b(keys[7], (E,)),
    }


def flash_scgpt_mha_forward(params, pcpt_total_embs, gen_total_embs, num_heads,
                            pcpt_key_padding_mask=None, gen_key_padding_mask=None,
                            causal=False, linear_fn=linear, attn_fn=multihead_attention):
    B, Sp, E = pcpt_total_embs.shape
    H = num_heads
    D = E // H
    scale = 1.0 / math.sqrt(D)

    # ---------------- pcpt self-attention (flash_attn path) ----------------
    pcpt_qkv = linear_fn(pcpt_total_embs, params["Wqkv_wT"], params["Wqkv_b"],
                         out_dtype=jnp.bfloat16)                  # (B, Sp, 3E)
    # '(three h d)' layout => q/k/v are contiguous E-slices with heads in (h d) order
    pq, pk, pv = pcpt_qkv[..., :E], pcpt_qkv[..., E:2 * E], pcpt_qkv[..., 2 * E:]

    if pcpt_key_padding_mask is not None:  # 1/True = valid
        pcpt_key_bias = jnp.where(pcpt_key_padding_mask, 0.0, NEG_INF).astype(jnp.float32)
    else:
        pcpt_key_bias = jnp.zeros((B, Sp), jnp.float32)

    pcpt_ctx = attn_fn(pq, pk, pv, pcpt_key_bias, H, scale, causal=causal)  # (B,Sp,E)
    pcpt_context = linear_fn(pcpt_ctx, params["out_proj_wT"], params["out_proj_b"],
                             out_dtype=jnp.float32)

    if gen_total_embs is None:
        return (pcpt_context, None), (None, None)

    # ---------------- gen cross-attention (nn.MultiheadAttention path) ------
    Sg = gen_total_embs.shape[1]
    gen_qkv = linear_fn(gen_total_embs, params["Wqkv_wT"], params["Wqkv_b"],
                        out_dtype=jnp.bfloat16)                   # (B, Sg, 3E)

    cross_q_in = gen_qkv[..., :E]
    cross_k_in = jnp.concatenate([pcpt_qkv[..., E:2 * E], gen_qkv[..., E:2 * E]], axis=1)
    cross_v_in = jnp.concatenate([pcpt_qkv[..., 2 * E:], gen_qkv[..., 2 * E:]], axis=1)

    # nn.MultiheadAttention applies its own in_proj on q/k/v
    WqT = params["cross_in_proj_wT"][:, :E]
    WkT = params["cross_in_proj_wT"][:, E:2 * E]
    WvT = params["cross_in_proj_wT"][:, 2 * E:]
    bq = params["cross_in_proj_b"][:E]
    bk = params["cross_in_proj_b"][E:2 * E]
    bv = params["cross_in_proj_b"][2 * E:]

    cq = linear_fn(cross_q_in, WqT, bq, out_dtype=jnp.bfloat16)   # (B, Sg, E)
    ck = linear_fn(cross_k_in, WkT, bk, out_dtype=jnp.bfloat16)   # (B, Sp+Sg, E)
    cv = linear_fn(cross_v_in, WvT, bv, out_dtype=jnp.bfloat16)

    if pcpt_key_padding_mask is not None or gen_key_padding_mask is not None:
        pkm = (pcpt_key_padding_mask if pcpt_key_padding_mask is not None
               else jnp.ones((B, Sp), bool))
        gkm = (gen_key_padding_mask if gen_key_padding_mask is not None
               else jnp.ones((B, Sg), bool))
        kpm_valid = jnp.concatenate([pkm, gkm], axis=1)
        cross_key_bias = jnp.where(kpm_valid, 0.0, NEG_INF).astype(jnp.float32)
    else:
        cross_key_bias = jnp.zeros((B, Sp + Sg), jnp.float32)

    # gen query i may attend to all pcpt keys + its own gen key (built in-kernel)
    gen_ctx = attn_fn(cq, ck, cv, cross_key_bias, H, scale,
                      gen_eye=True, kv_offset=Sp)                 # (B, Sg, E)
    gen_context = linear_fn(gen_ctx, params["cross_out_proj_wT"],
                            params["cross_out_proj_b"], out_dtype=jnp.float32)

    # TODO(synk): need_weights=True and attention_dropout>0 not supported
    #             (matches the dropout_p=0.0 / weights=None path of the module).
    return (pcpt_context, gen_context), (None, None)


# ----------------------------------------------------------------------------
if __name__ == "__main__":
    key = jax.random.PRNGKey(0)
    B, H, D = 2, 4, 8
    E = H * D            # 32
    Sp, Sg = 16, 8

    kp, kg, kparam = jax.random.split(key, 3)
    pcpt = jax.random.normal(kp, (B, Sp, E), jnp.float32)
    gen = jax.random.normal(kg, (B, Sg, E), jnp.float32)
    params = init_params(kparam, E)

    # ---- run 1: no masks ----
    (pcpt_ctx, gen_ctx), _ = flash_scgpt_mha_forward(params, pcpt, gen, H)
    jax.block_until_ready((pcpt_ctx, gen_ctx))
    (ref_p, ref_g), _ = flash_scgpt_mha_forward(
        params, pcpt, gen, H, linear_fn=_ref_linear, attn_fn=_ref_attn)
    assert pcpt_ctx.shape == (B, Sp, E) and gen_ctx.shape == (B, Sg, E)
    assert jnp.allclose(pcpt_ctx, ref_p, atol=5e-3, rtol=5e-3), "pcpt context mismatch"
    assert jnp.allclose(gen_ctx, ref_g, atol=5e-3, rtol=5e-3), "gen context mismatch"

    # ---- run 2: key-padding masks + causal self-attention ----
    pcpt_kpm = jnp.arange(Sp)[None, :] < jnp.array([[Sp], [Sp - 3]])
    gen_kpm = jnp.arange(Sg)[None, :] < jnp.array([[Sg], [Sg - 2]])
    (pcpt_ctx2, gen_ctx2), _ = flash_scgpt_mha_forward(
        params, pcpt, gen, H, pcpt_key_padding_mask=pcpt_kpm,
        gen_key_padding_mask=gen_kpm, causal=True)
    jax.block_until_ready((pcpt_ctx2, gen_ctx2))
    (ref_p2, ref_g2), _ = flash_scgpt_mha_forward(
        params, pcpt, gen, H, pcpt_key_padding_mask=pcpt_kpm,
        gen_key_padding_mask=gen_kpm, causal=True,
        linear_fn=_ref_linear, attn_fn=_ref_attn)
    assert jnp.allclose(pcpt_ctx2, ref_p2, atol=5e-3, rtol=5e-3), "masked pcpt mismatch"
    assert jnp.allclose(gen_ctx2, ref_g2, atol=5e-3, rtol=5e-3), "masked gen mismatch"

    print("KERNEL_OK")
</pallas_src>

<mosaic_0001>
module attributes {stable_mosaic.version = 11 : i64} {
  func.func @_linear_kernel(%arg0: i32, %arg1: i32, %arg2: i32, %arg3: memref<32x32xbf16, #tpu.memory_space<vmem>>, %arg4: memref<32x96xbf16, #tpu.memory_space<vmem>>, %arg5: memref<1x96xf32, #tpu.memory_space<vmem>>, %arg6: memref<32x96xbf16, #tpu.memory_space<vmem>>, %arg7: memref<32x96xf32, #tpu.memory_space<vmem>>) attributes {dimension_semantics = [#tpu.dimension_semantics<parallel>, #tpu.dimension_semantics<parallel>, #tpu.dimension_semantics<arbitrary>], iteration_bounds = array<i64: 1, 1, 1>, scalar_prefetch = 0 : i64, scratch_operands = 1 : i64, tpu.core_type = #tpu.core_type<tc>, window_params = [{transform_indices = @transform_0, window_bounds = array<i64: 32, 32>}, {transform_indices = @transform_1, window_bounds = array<i64: 32, 96>}, {transform_indices = @transform_2, window_bounds = array<i64: 1, 96>}, {transform_indices = @transform_3, window_bounds = array<i64: 32, 96>}]} {
    %c0_i32 = arith.constant 0 : i32
    %0 = arith.cmpi eq, %arg2, %c0_i32 : i32
    %1 = arith.extui %0 : i1 to i32
    %c0_i32_0 = arith.constant 0 : i32
    %2 = arith.cmpi ne, %1, %c0_i32_0 : i32
    scf.if %2 {
      %cst_10 = arith.constant 0.000000e+00 : f32
      %12 = vector.broadcast %cst_10 : f32 to vector<32x96xf32>
      %c0_11 = arith.constant 0 : index
      %c0_12 = arith.constant 0 : index
      %13 = vector.load %arg7[%c0_11, %c0_12] : memref<32x96xf32, #tpu.memory_space<vmem>>, vector<32x96xf32>
      tpu.vector_store %arg7[%c0_11, %c0_12], %12 {strides = array<i32>} : memref<32x96xf32, #tpu.memory_space<vmem>>, vector<32x96xf32>,
    } else {
    }
    %c0 = arith.constant 0 : index
    %c0_1 = arith.constant 0 : index
    %3 = vector.load %arg7[%c0, %c0_1] : memref<32x96xf32, #tpu.memory_space<vmem>>, vector<32x96xf32>
    %c0_2 = arith.constant 0 : index
    %c0_3 = arith.constant 0 : index
    %4 = vector.load %arg3[%c0_2, %c0_3] : memref<32x32xbf16, #tpu.memory_space<vmem>>, vector<32x32xbf16>
    %c0_4 = arith.constant 0 : index
    %c0_5 = arith.constant 0 : index
    %5 = vector.load %arg4[%c0_4, %c0_5] : memref<32x96xbf16, #tpu.memory_space<vmem>>, vector<32x96xbf16>
    %cst = arith.constant dense<0.000000e+00> : vector<32x96xf32>
    %6 = tpu.matmul %4, %5, %cst {dimension_numbers = #tpu.dot_dimension_numbers<[1], [0], [0], [1], [0, 0, 1, 1], [], []>} : vector<32x32xbf16>, vector<32x96xbf16>, vector<32x96xf32> -> vector<32x96xf32>
    %7 = arith.addf %3, %6 : vector<32x96xf32>
    %c0_6 = arith.constant 0 : index
    %c0_7 = arith.constant 0 : index
    %8 = vector.load %arg7[%c0_6, %c0_7] : memref<32x96xf32, #tpu.memory_space<vmem>>, vector<32x96xf32>
    tpu.vector_store %arg7[%c0_6, %c0_7], %7 {strides = array<i32>} : memref<32x96xf32, #tpu.memory_space<vmem>>, vector<32x96xf32>,
    %c0_i32_8 = arith.constant 0 : i32
    %9 = arith.cmpi eq, %arg2, %c0_i32_8 : i32
    %10 = arith.extui %9 : i1 to i32
    %c0_i32_9 = arith.constant 0 : i32
    %11 = arith.cmpi ne, %10, %c0_i32_9 : i32
    scf.if %11 {
      %c0_10 = arith.constant 0 : index
      %c0_11 = arith.constant 0 : index
      %12 = vector.load %arg7[%c0_10, %c0_11] : memref<32x96xf32, #tpu.memory_space<vmem>>, vector<32x96xf32>
      %c0_12 = arith.constant 0 : index
      %c0_13 = arith.constant 0 : index
      %13 = vector.load %arg5[%c0_12, %c0_13] : memref<1x96xf32, #tpu.memory_space<vmem>>, vector<1x96xf32>
      %14 = vector.broadcast %13 : vector<1x96xf32> to vector<32x96xf32>
      %15 = arith.addf %12, %14 : vector<32x96xf32>
      %16 = arith.truncf %15 : vector<32x96xf32> to vector<32x96xbf16>
      %c0_14 = arith.constant 0 : index
      %c0_15 = arith.constant 0 : index
      %17 = vector.load %arg6[%c0_14, %c0_15] : memref<32x96xbf16, #tpu.memory_space<vmem>>, vector<32x96xbf16>
      tpu.vector_store %arg6[%c0_14, %c0_15], %16 {strides = array<i32>} : memref<32x96xbf16, #tpu.memory_space<vmem>>, vector<32x96xbf16>,
    } else {
    }
    return
  }
  func.func @transform_0(%arg0: i32, %arg1: i32, %arg2: i32) -> (i32, i32) {
    %c0_i32 = arith.constant 0 : i32
    return %arg0, %arg2 : i32, i32
  }
  func.func @transform_1(%arg0: i32, %arg1: i32, %arg2: i32) -> (i32, i32) {
    %c0_i32 = arith.constant 0 : i32
    return %arg2, %arg1 : i32, i32
  }
  func.func @transform_2(%arg0: i32, %arg1: i32, %arg2: i32) -> (i32, i32) {
    %c0_i32 = arith.constant 0 : i32
    %c0_i32_0 = arith.constant 0 : i32
    return %c0_i32, %arg1 : i32, i32
  }
  func.func @transform_3(%arg0: i32, %arg1: i32, %arg2: i32) -> (i32, i32) {
    %c0_i32 = arith.constant 0 : i32
    return %arg0, %arg1 : i32, i32
  }
}

</mosaic_0001>

<bundles_post_ra>
// kernel: tpu_custom_call.1
= control target key start
LH: loop header
LB: loop body
LE: loop exit
PB: predicated region body
PF: predicated region fallthrough
CT: control target
= control target key end

     0   :  { %8 = vsyncpa [#allocation4], 0  ;;  %s400_s0 = inlined_call_operand.hbm [shape: bf16[32,32], index: 0, kind: input, shape index: {}]   ;;  %s401_s1 = inlined_call_operand.hbm [shape: bf16[32,96], index: 1, kind: input, shape index: {}]   ;;  %s402_s2 = inlined_call_operand.vmem [shape: f32[1,96], index: 2, kind: input, shape index: {}]   ;;  %s403_s3 = inlined_call_operand.hbm [shape: bf16[32,96], index: 3, kind: output, shape index: {}]  }
   0x1   :  { %9 = vsyncpa [#allocation7], 0 }
   0x2   :  { %10 = vsyncpa [#allocation5], 0  ;;  %s318_s12 = smov [#allocation3]   ;;  %s246_s16 = scalar_lea.hbm %s400_s0, 256 }
   0x3   :  { %s16_s13 = sshll.u32 %s318_s12, 4  ;;  %p247_p0 = scmp.ne.s32.totalorder %s400_s0, %s246_s16  ;;  %s17_s13 = int_to_ptr.vmem [resolvable:$true] %s16_s13 }
   0x4   :  { %p250_p1 = scmp.lt.u32.totalorder %s246_s16, %s400_s0 }
   0x6   :  { %p252_p2 = pnand %p250_p1, %p247_p0 }
   0x8   :  { %255 = shalt.err (!%p252_p2)
}
   0x9   :  { %s256_s21 = scalar_lea.vmem %s17_s13, 256  ;;  %p261_p4 = scmp.lt.s32.totalorder %s17_s13, %s17_s13 }
   0xa   :  { %p257_p3 = scmp.ne.s32.totalorder %s17_s13, %s256_s21  ;;  %p262_p5 = scmp.lt.s32.totalorder %s256_s21, %s256_s21 }
   0xc   :  { %p263_p6 = por %p262_p5, %p261_p4 }
   0xe   :  { %p264_p7 = pnand %p263_p6, %p257_p3 }
  0x10   :  { %267 = shalt.err (!%p264_p7)
}
  0x11   :  { %s319_s22 = smov 64   ;;  %s320_s23 = smov 4  }
  0x12   :  { %22 = dma.hbm_to_vmem [thread:$0]  %s400_s0, 256, %s17_s13, [#allocation4], %s319_s22, %s319_s22, %s320_s23  }
  0x13   :  { %s321_s26 = smov [#allocation6]   ;;  %s268_s30 = scalar_lea.hbm %s401_s1, 256 }
  0x14   :  { %s28_s27 = sshll.u32 %s321_s26, 4  ;;  %p269_p8 = scmp.ne.s32.totalorder %s401_s1, %s268_s30  ;;  %s29_s27 = int_to_ptr.vmem [resolvable:$true] %s28_s27 }
  0x15   :  { %p272_p9 = scmp.lt.u32.totalorder %s268_s30, %s401_s1 }
  0x17   :  { %p274_p10 = pnand %p272_p9, %p269_p8 }
  0x19   :  { %277 = shalt.err (!%p274_p10)
}
  0x1a   :  { %s278_s8 = scalar_lea.vmem %s29_s27, 256  ;;  %p283_p12 = scmp.lt.s32.totalorder %s29_s27, %s29_s27 }
  0x1b   :  { %p279_p11 = scmp.ne.s32.totalorder %s29_s27, %s278_s8  ;;  %p284_p13 = scmp.lt.s32.totalorder %s278_s8, %s278_s8 }
  0x1d   :  { %p285_p0 = por %p284_p13, %p283_p12 }
  0x1f   :  { %p286_p1 = pnand %p285_p0, %p279_p11 }
  0x21   :  { %289 = shalt.err (!%p286_p1)
}
  0x22   :  { %34 = dma.hbm_to_vmem [thread:$0]  %s401_s1, 256, %s29_s27, [#allocation7], %s319_s22, %s319_s22, %s320_s23  }
  0x23   :  { %312 = dma.done.wait [#allocation4], 256  }
  0x24   :  { %313 = vsyncadd [#allocation4], 4294967040 }
  0x25   :  { %314 = dma.done.wait [#allocation7], 256  }
  0x26   :  { %315 = vsyncadd [#allocation7], 4294967040  ;;  %vm48_vm0 = vcmask 785408   ;;  %v322_v0 = vmov 0.0   ;;  %v242_v1 = vld [vmem:[#allocation6] sm:$0xff]   ;;  %v243_v2 = vld [vmem:[#allocation6 + $0x8] sm:$0xff]  }
  0x27   :  { %51 = vst.msk [vmem:[#allocation2 + $0x10] sm:$0xff] %vm48_vm0, %v322_v0  ;;  %49 = vst.msk [vmem:[#allocation2] sm:$0xff] %vm48_vm0, %v322_v0  ;;  %vm87_vm1 = vcmask 261120   ;;  %228 = vmatprep.subr.bf16.mxu0 %v242_v1  ;;  %v244_v3 = vld [vmem:[#allocation3] sm:$0xff]   ;;  %v245_v4 = vld [vmem:[#allocation3 + $0x8] sm:$0xff]   ;;  %vm186_vm2 = vcmask 781312  }
  0x28   :  { %50 = vst.msk [vmem:[#allocation2 + $0x8] sm:$0xff] %vm48_vm0, %v322_v0  ;;  %52 = vst.msk [vmem:[#allocation2 + $0x18] sm:$0xff] %vm48_vm0, %v322_v0  ;;  %229 = vmatpush3.bf16.msra.mxu0 %v242_v1  ;;  %232 = vmatprep.mubr.msk.bf16.mxu0 %vm87_vm1, %v244_v3  ;;  %v215_v17 = vld [vmem:[%s402_s2] ss:$0 sm:$0xff]  ;;  %s323_s11 = smov [#allocation8]  }
  0x29   :  { %230 = vmatprep.subr.bf16.mxu0 %v243_v2  ;;  %s196_s12 = sshll.u32 %s323_s11, 4  ;;  %s197_s12 = int_to_ptr.vmem [resolvable:$true] %s196_s12 }
  0x2a   :  { %s290_s2 = scalar_lea.vmem %s197_s12, 256  ;;  %p295_p3 = scmp.lt.s32.totalorder %s197_s12, %s197_s12 }
  0x2b   :  { %p291_p2 = scmp.ne.s32.totalorder %s197_s12, %s290_s2  ;;  %p296_p4 = scmp.lt.s32.totalorder %s290_s2, %s290_s2 }
  0x2c   :  { %231 = vmatpush3.bf16.msra.mxu0 %v243_v2 }
  0x2d   :  { %p297_p5 = por %p296_p4, %p295_p3 }
  0x2e   :  { %v55_v5 = vld [vmem:[#allocation2 + $0x10] sm:$0xff]  ;;  %v53_v6 = vld [vmem:[#allocation2] sm:$0xff] }
  0x2f   :  { %233 = vmatmul.mubr.msk.bf16.vlgmr.msra.gmra.mrb[0].mxu0 %vm87_vm1, %v245_v4  ;;  %v56_v8 = vld [vmem:[#allocation2 + $0x18] sm:$0xff]  ;;  %v54_v11 = vld [vmem:[#allocation2 + $0x8] sm:$0xff]  ;;  %p298_p6 = pnand %p297_p5, %p291_p2 }
 0x102   :  { %v234_v7 = vpop.f32.mrb[0].mxu0 }
 0x103   :  { %v145_v9 = vadd.f32 %v234_v7, %v55_v5  ;;  %v128_v10 = vpop.f32.mrb[1].mxu0 }
 0x104   :  { %v143_v12 = vadd.f32 %v128_v10, %v53_v6  ;;  %v235_v13 = vpop.f32.mrb[2].mxu0 }
 0x105   :  { %150 = vst.msk [vmem:[#allocation2 + $0x10] sm:$0xff] %vm48_vm0, %v145_v9  ;;  %v146_v14 = vadd.f32 %v235_v13, %v56_v8  ;;  %v131_v15 = vpop.f32.mrb[3].mxu0 }
 0x106   :  { %148 = vst.msk [vmem:[#allocation2] sm:$0xff] %vm48_vm0, %v143_v12  ;;  %v144_v16 = vadd.f32 %v131_v15, %v54_v11 }
 0x107   :  { %151 = vst.msk [vmem:[#allocation2 + $0x18] sm:$0xff] %vm48_vm0, %v146_v14 }
 0x108   :  { %149 = vst.msk [vmem:[#allocation2 + $0x8] sm:$0xff] %vm48_vm0, %v144_v16 }
 0x10c   :  { %v157_v18 = vld [vmem:[#allocation2 + $0x10] sm:$0xff] }
 0x10d   :  { %v155_v19 = vld [vmem:[#allocation2] sm:$0xff]  ;;  %v168_v20 = vadd.f32 %v215_v17, %v157_v18 }
 0x10e   :  { %v158_v21 = vld [vmem:[#allocation2 + $0x18] sm:$0xff]  ;;  %v166_v22 = vadd.f32 %v215_v17, %v155_v19 }
 0x10f   :  { %v156_v23 = vld [vmem:[#allocation2 + $0x8] sm:$0xff]  ;;  %v169_v24 = vadd.f32 %v215_v17, %v158_v21  ;;  %v222_v25 = vpack.c.bf16 %v168_v20, %v168_v20 }
 0x110   :  { %v167_v26 = vadd.f32 %v215_v17, %v156_v23  ;;  %v220_v27 = vpack.c.bf16 %v166_v22, %v166_v22 }
 0x111   :  { %v223_v28 = vpack.c.bf16 %v169_v24, %v169_v24  ;;  %189 = vst.msk [vmem:[#allocation8 + $0x8] sm:$0xf] %vm186_vm2, %v222_v25 }
 0x112   :  { %v221_v29 = vpack.c.bf16 %v167_v26, %v167_v26  ;;  %187 = vst.msk [vmem:[#allocation8] sm:$0xf] %vm186_vm2, %v220_v27 }
 0x113   :  { %190 = vst.msk [vmem:[#allocation8 + $0xc] sm:$0xf] %vm186_vm2, %v223_v28 }
 0x114   :  { %188 = vst.msk [vmem:[#allocation8 + $0x4] sm:$0xf] %vm186_vm2, %v221_v29 }
 0x115   :  { %301 = shalt.err (!%p298_p6)
}
 0x116   :  { %s302_s15 = scalar_lea.hbm %s403_s3, 256 }
 0x117   :  { %p303_p7 = scmp.ne.s32.totalorder %s403_s3, %s302_s15  ;;  %p306_p8 = scmp.lt.u32.totalorder %s302_s15, %s403_s3 }
 0x119   :  { %p308_p9 = pnand %p306_p8, %p303_p7 }
 0x11b   :  { %311 = shalt.err (!%p308_p9)
}
 0x11c   :  { %202 = dma.vmem_to_hbm [thread:$0]  %s197_s12, 256, %s403_s3, [#allocation5], %s319_s22, %s319_s22, %s320_s23  }
 0x11d   :  { %316 = dma.done.wait [#allocation5], 256  }
 0x11e   :  { %317 = vsyncadd [#allocation5], 4294967040 }
 0x11f   :  { %206 = vsyncpa [#allocation4], 1 }
 0x120   :  { %207 = vsyncpa [#allocation7], 1 }
 0x121   :  { %208 = vsyncpa [#allocation5], 1 }

</bundles_post_ra>
